<compile_context>
chip_gen: v6e
topology: v6e:2x2x1
jax: 0.10.0
libtpu: 0.0.40
codegen_flags: <defaults>
</compile_context>

<pallas_src>
import jax
import jax.numpy as jnp
import numpy as np
from jax.experimental import pallas as pl
from jax.experimental.pallas import tpu as pltpu

NUM_MODELS = 7


def _ensemble_kernel(w_ref, x_ref, out_ref):
    # w_ref:   SMEM (2, Cin)   folded ensemble weights
    # x_ref:   VMEM (Cin, L)   lane-dense slab of the input (batch folded in)
    # out_ref: VMEM (2, L)     softmax(dim=channel) of the two ensemble maps
    x = x_ref[...]                                    # (Cin, L) f32
    cin = x.shape[0]

    # (2, Cin) x (Cin, L) contraction as VPU broadcast FMAs: Cin is tiny, so
    # this avoids MXU push/pop latency and padded weight tiles entirely.
    o0 = w_ref[0, 0] * x[0:1, :]
    o1 = w_ref[1, 0] * x[0:1, :]
    for k in range(1, cin):
        xk = x[k:k + 1, :]
        o0 = o0 + w_ref[0, k] * xk
        o1 = o1 + w_ref[1, k] * xk

    # softmax over the 2-channel axis written as a numerically stable sigmoid:
    # one exp (EUP) + one reciprocal instead of two exps + divide.
    d = o1 - o0                                       # (1, L)
    e = jnp.exp(-jnp.abs(d))
    inv = pl.reciprocal(1.0 + e, approx=False)
    p1 = jnp.where(d >= 0, inv, e * inv)              # prob of channel 1
    p0 = 1.0 - p1                                     # prob of channel 0
    out_ref[...] = jnp.concatenate([p0, p1], axis=0)  # single (2, L) store


def _pick_lane_tile(total, max_tile=8 * 1024):
    """Largest lane tile (multiple of 128) dividing `total`, capped at max_tile,
    preferring >= 2 grid steps so both v7x TensorCores get work."""
    if total % 128 != 0 or total <= 128:
        return total                       # single full-extent block
    tile = min(max_tile, total)
    tile -= tile % 128
    while total % tile != 0:
        tile -= 128
    if tile == total:                      # expose >= 2 parallel steps
        half = total // 2
        if half % 128 == 0:
            tile = half
    return tile


def ensembled_model_forward(x, sub_w, conv0_w, conv1_w):
    """x: [B, Cin, H, W] f32; sub_w: [7, 2, Cin]; conv0_w/conv1_w: [7]."""
    B, Cin, H, W = x.shape
    total = B * H * W

    # Algebraic fold of the 7 sub-model 1x1 convs + ensemble convs (exact,
    # ~56 FLOPs of plain JAX):
    w_eff = jnp.stack(
        [conv0_w @ sub_w[:, 0, :], conv1_w @ sub_w[:, 1, :]], axis=0
    ).astype(jnp.float32)                                          # (2, Cin)

    # Fold batch into the lane axis -> lane-dense slabs.
    x_flat = jnp.transpose(x, (1, 0, 2, 3)).reshape(Cin, total)    # (Cin, B*H*W)

    tile = _pick_lane_tile(total)
    grid = (total // tile,)

    cost = pl.CostEstimate(
        flops=total * (4 * Cin + 8),
        transcendentals=total,
        bytes_accessed=total * (Cin + 2) * 4,
    )

    out_flat = pl.pallas_call(
        _ensemble_kernel,
        out_shape=jax.ShapeDtypeStruct((2, total), jnp.float32),
        grid_spec=pl.GridSpec(
            grid=grid,
            in_specs=[
                pl.BlockSpec(memory_space=pltpu.MemorySpace.SMEM),  # w_eff (tiny)
                pl.BlockSpec((Cin, tile), lambda i: (0, i)),        # x slab
            ],
            out_specs=pl.BlockSpec((2, tile), lambda i: (0, i)),
        ),
        compiler_params=pltpu.CompilerParams(
            dimension_semantics=("parallel",)),
        cost_estimate=cost,
    )(w_eff, x_flat)

    return jnp.transpose(out_flat.reshape(2, B, H, W), (1, 0, 2, 3))


def reference_forward(x, sub_w, conv0_w, conv1_w):
    """Pure-JAX reference mirroring the PyTorch module."""
    preds = jnp.einsum('moc,bchw->bmohw', sub_w, x)                # (B, 7, 2, H, W)
    pred_0 = preds[:, :, 0, :, :]                                  # (B, 7, H, W)
    pred_1 = preds[:, :, 1, :, :]                                  # (B, 7, H, W)
    o0 = jnp.einsum('m,bmhw->bhw', conv0_w, pred_0)[:, None]       # (B, 1, H, W)
    o1 = jnp.einsum('m,bmhw->bhw', conv1_w, pred_1)[:, None]       # (B, 1, H, W)
    logits = jnp.concatenate([o0, o1], axis=1)                     # (B, 2, H, W)
    return jax.nn.softmax(logits, axis=1)


if __name__ == "__main__":
    B, Cin, H, W = 2, 4, 16, 16

    key = jax.random.PRNGKey(0)
    kx, ksub, kc0, kc1 = jax.random.split(key, 4)

    x = jax.random.normal(kx, (B, Cin, H, W), dtype=jnp.float32)
    # 7 sub-models: 1x1 conv weights [7 models, 2 out channels, Cin]
    sub_w = jax.random.normal(ksub, (NUM_MODELS, 2, Cin), dtype=jnp.float32) * 0.1
    # nn.Conv2d(7, 1, kernel_size=1, bias=False).weight has shape [1,7,1,1]
    conv0_w = jax.random.normal(kc0, (NUM_MODELS,), dtype=jnp.float32) * 0.2
    conv1_w = jax.random.normal(kc1, (NUM_MODELS,), dtype=jnp.float32) * 0.2

    out = ensembled_model_forward(x, sub_w, conv0_w, conv1_w)
    out = jax.block_until_ready(out)

    ref = reference_forward(x, sub_w, conv0_w, conv1_w)
    np.testing.assert_allclose(np.asarray(out), np.asarray(ref),
                               rtol=1e-5, atol=1e-5)
    assert out.shape == (B, 2, H, W)
    print("KERNEL_OK")
</pallas_src>

<mosaic_0001>
module attributes {stable_mosaic.version = 11 : i64} {
  func.func @_ensemble_kernel(%arg0: i32, %arg1: memref<2x4xf32, #tpu.memory_space<smem>>, %arg2: memref<4x256xf32, #tpu.memory_space<vmem>>, %arg3: memref<2x256xf32, #tpu.memory_space<vmem>>) attributes {dimension_semantics = [#tpu.dimension_semantics<parallel>], iteration_bounds = array<i64: 2>, scalar_prefetch = 0 : i64, scratch_operands = 0 : i64, tpu.core_type = #tpu.core_type<tc>, window_params = [{transform_indices = @transform_0, window_bounds = array<i64: 2, 4>}, {transform_indices = @transform_1, window_bounds = array<i64: 4, 256>}, {transform_indices = @transform_2, window_bounds = array<i64: 2, 256>}]} {
    %c0 = arith.constant 0 : index
    %c0_0 = arith.constant 0 : index
    %0 = vector.load %arg2[%c0, %c0_0] : memref<4x256xf32, #tpu.memory_space<vmem>>, vector<4x256xf32>
    %c0_1 = arith.constant 0 : index
    %c0_2 = arith.constant 0 : index
    %1 = memref.load %arg1[%c0_1, %c0_2] : memref<2x4xf32, #tpu.memory_space<smem>>
    %2 = vector.extract_strided_slice %0 {offsets = [0, 0], sizes = [1, 256], strides = [1, 1]} : vector<4x256xf32> to vector<1x256xf32>
    %3 = vector.broadcast %1 : f32 to vector<1x256xf32>
    %4 = arith.mulf %3, %2 : vector<1x256xf32>
    %c1 = arith.constant 1 : index
    %c0_3 = arith.constant 0 : index
    %5 = memref.load %arg1[%c1, %c0_3] : memref<2x4xf32, #tpu.memory_space<smem>>
    %6 = vector.extract_strided_slice %0 {offsets = [0, 0], sizes = [1, 256], strides = [1, 1]} : vector<4x256xf32> to vector<1x256xf32>
    %7 = vector.broadcast %5 : f32 to vector<1x256xf32>
    %8 = arith.mulf %7, %6 : vector<1x256xf32>
    %9 = vector.extract_strided_slice %0 {offsets = [1, 0], sizes = [1, 256], strides = [1, 1]} : vector<4x256xf32> to vector<1x256xf32>
    %c0_4 = arith.constant 0 : index
    %c1_5 = arith.constant 1 : index
    %10 = memref.load %arg1[%c0_4, %c1_5] : memref<2x4xf32, #tpu.memory_space<smem>>
    %11 = vector.broadcast %10 : f32 to vector<1x256xf32>
    %12 = arith.mulf %11, %9 : vector<1x256xf32>
    %13 = arith.addf %4, %12 : vector<1x256xf32>
    %c1_6 = arith.constant 1 : index
    %c1_7 = arith.constant 1 : index
    %14 = memref.load %arg1[%c1_6, %c1_7] : memref<2x4xf32, #tpu.memory_space<smem>>
    %15 = vector.broadcast %14 : f32 to vector<1x256xf32>
    %16 = arith.mulf %15, %9 : vector<1x256xf32>
    %17 = arith.addf %8, %16 : vector<1x256xf32>
    %18 = vector.extract_strided_slice %0 {offsets = [2, 0], sizes = [1, 256], strides = [1, 1]} : vector<4x256xf32> to vector<1x256xf32>
    %c0_8 = arith.constant 0 : index
    %c2 = arith.constant 2 : index
    %19 = memref.load %arg1[%c0_8, %c2] : memref<2x4xf32, #tpu.memory_space<smem>>
    %20 = vector.broadcast %19 : f32 to vector<1x256xf32>
    %21 = arith.mulf %20, %18 : vector<1x256xf32>
    %22 = arith.addf %13, %21 : vector<1x256xf32>
    %c1_9 = arith.constant 1 : index
    %c2_10 = arith.constant 2 : index
    %23 = memref.load %arg1[%c1_9, %c2_10] : memref<2x4xf32, #tpu.memory_space<smem>>
    %24 = vector.broadcast %23 : f32 to vector<1x256xf32>
    %25 = arith.mulf %24, %18 : vector<1x256xf32>
    %26 = arith.addf %17, %25 : vector<1x256xf32>
    %27 = vector.extract_strided_slice %0 {offsets = [3, 0], sizes = [1, 256], strides = [1, 1]} : vector<4x256xf32> to vector<1x256xf32>
    %c0_11 = arith.constant 0 : index
    %c3 = arith.constant 3 : index
    %28 = memref.load %arg1[%c0_11, %c3] : memref<2x4xf32, #tpu.memory_space<smem>>
    %29 = vector.broadcast %28 : f32 to vector<1x256xf32>
    %30 = arith.mulf %29, %27 : vector<1x256xf32>
    %31 = arith.addf %22, %30 : vector<1x256xf32>
    %c1_12 = arith.constant 1 : index
    %c3_13 = arith.constant 3 : index
    %32 = memref.load %arg1[%c1_12, %c3_13] : memref<2x4xf32, #tpu.memory_space<smem>>
    %33 = vector.broadcast %32 : f32 to vector<1x256xf32>
    %34 = arith.mulf %33, %27 : vector<1x256xf32>
    %35 = arith.addf %26, %34 : vector<1x256xf32>
    %36 = arith.subf %35, %31 : vector<1x256xf32>
    %37 = math.absf %36 : vector<1x256xf32>
    %cst = arith.constant 0.000000e+00 : f32
    %38 = vector.broadcast %cst : f32 to vector<1x256xf32>
    %39 = arith.subf %38, %37 : vector<1x256xf32>
    %40 = math.exp %39 : vector<1x256xf32>
    %cst_14 = arith.constant 1.000000e+00 : f32
    %41 = vector.broadcast %cst_14 : f32 to vector<1x256xf32>
    %42 = arith.addf %41, %40 : vector<1x256xf32>
    %43 = tpu.reciprocal %42 : vector<1x256xf32> -> vector<1x256xf32>
    %cst_15 = arith.constant 0.000000e+00 : f32
    %44 = vector.broadcast %cst_15 : f32 to vector<1x256xf32>
    %45 = arith.cmpf oge, %36, %44 : vector<1x256xf32>
    %46 = arith.mulf %40, %43 : vector<1x256xf32>
    %47 = arith.select %45, %43, %46 : vector<1x256xi1>, vector<1x256xf32>
    %cst_16 = arith.constant 1.000000e+00 : f32
    %48 = vector.broadcast %cst_16 : f32 to vector<1x256xf32>
    %49 = arith.subf %48, %47 : vector<1x256xf32>
    %50 = tpu.concatenate %49, %47 in 0 : vector<1x256xf32>, vector<1x256xf32> -> vector<2x256xf32>
    %c0_17 = arith.constant 0 : index
    %c0_18 = arith.constant 0 : index
    %51 = vector.load %arg3[%c0_17, %c0_18] : memref<2x256xf32, #tpu.memory_space<vmem>>, vector<2x256xf32>
    tpu.vector_store %arg3[%c0_17, %c0_18], %50 {strides = array<i32>} : memref<2x256xf32, #tpu.memory_space<vmem>>, vector<2x256xf32>,
    return
  }
  func.func @transform_0(%arg0: i32) -> (i32, i32) {
    %c0_i32 = arith.constant 0 : i32
    %c0_i32_0 = arith.constant 0 : i32
    %c0_i32_1 = arith.constant 0 : i32
    return %c0_i32, %c0_i32_0 : i32, i32
  }
  func.func @transform_1(%arg0: i32) -> (i32, i32) {
    %c0_i32 = arith.constant 0 : i32
    %c0_i32_0 = arith.constant 0 : i32
    return %c0_i32, %arg0 : i32, i32
  }
  func.func @transform_2(%arg0: i32) -> (i32, i32) {
    %c0_i32 = arith.constant 0 : i32
    %c0_i32_0 = arith.constant 0 : i32
    return %c0_i32, %arg0 : i32, i32
  }
}

</mosaic_0001>

<bundles_post_ra>
// kernel: tpu_custom_call.1
= control target key start
LH: loop header
LB: loop body
LE: loop exit
PB: predicated region body
PF: predicated region fallthrough
CT: control target
= control target key end

     0   :  { %7 = vsyncpa [#allocation5], 0  ;;  %s747_s0 = inlined_call_operand.hbm [shape: f32[2,4], index: 0, kind: input, shape index: {}]   ;;  %s748_s1 = inlined_call_operand.hbm [shape: f32[4,512], index: 1, kind: input, shape index: {}]   ;;  %s749_s2 = inlined_call_operand.hbm [shape: f32[2,512], index: 2, kind: output, shape index: {}]  }
   0x1   :  { %8 = vsyncpa [#allocation3], 0 }
   0x2   :  { %10 = vsyncpa [#allocation3 + $0x1], 0 }
   0x3   :  { %11 = vsyncpa [#allocation4], 0 }
   0x4   :  { %13 = vsyncpa [#allocation4 + $0x1], 0  ;;  %s594_s9 = smov 0   ;;  %s596_s10 = smov 0  }
   0x5   :  { %s598_s11 = smov 0   ;;  %s600_s12 = smov 0  }
   0x6 LB: > { %s615_s13 = sadd.s32 4294967295, %s574_s12   ;;  %s374_s14 = sadd.s32 4294967294, %s574_s12   ;;  %s574_s12 = sphi %s600_s12, %s769_s12   ;;  %s570_s11 = sphi %s598_s11, %s768_s11   ;;  %s566_s10 = sphi %s596_s10, %s767_s10   ;;  %s562_s9 = sphi %s594_s9, %s766_s9  }
   0x7   : > { %p60_p0 = scmp.ne.s32.totalorder %s566_s10, %s562_s9  ;;  %p750_p1 = scmp.eq.s32.totalorder %s615_s13, 0 }
   0x8   : > { %p84_p2 = scmp.eq.s32.totalorder %s615_s13, 1  ;;  %p90_p3 = scmp.eq.s32.totalorder %s374_s14, 1 }
   0x9   : > { %p624_p4 = por %p750_p1, %p60_p0  ;;  %p375_p5 = scmp.ge.s32.totalorder %s574_s12, 1 }
   0xa   : > { %p629_p6 = por %p90_p3, %p60_p0  ;;  %p97_p7 = scmp.lt.s32.totalorder %s574_s12, 3 }
   0xb   : > { %s754_s15 = scalar_select %p624_p4, 1, 0 }
   0xc   : > { %s755_s16 = scalar_select %p629_p6, 1, 0 }
   0xd   : > { %p634_p8 = pnand %p375_p5, %p97_p7  ;;  %s640_s18 = sadd.s32 1, %s574_s12  }
   0xe   : > { %s44_s19 = ssub.s32 %s574_s12, %s640_s18  ;;  %s47_s20 = sadd.s32 1, %s570_s11 }
   0xf   : > { %s756_s17 = scalar_select %p634_p8, 1, 0 }
  0x10   : > { %p414_p10 = pneg %p634_p8  ;;  %p45_p12 = scmp.eq.s32.totalorder %s44_s19, 0 }
  0x11   : > { %p54_p13 = scmp.ne.s32.totalorder %s570_s11, %s566_s10  ;;  %p55_p0 = scmp.eq.s32.totalorder %s574_s12, 0 }
  0x12   : > { %p415_p11 = pnand %p414_p10, %p750_p1  ;;  %p427_p3 = scmp.lt.s32.totalorder %s574_s12, 2 }
  0x13   : > { %s576_s21 = smov [#allocation2]   ;;  %p56_p5 = por %p55_p0, %p54_p13 }
  0x14   : > { %417 = dma.hbm_to_smem (!%p415_p11), %s747_s0, 32, %s576_s21, [#allocation5]  }
  0x15   : > { %s657_s24 = scalar_select %p45_p12, %s570_s11, %s47_s20  }
  0x16   : > { %p661_p7 = por %p84_p2, %p54_p13  ;;  %s119_s26 = sand.u32 1, %s570_s11  }
  0x17   : > { %s404_s27 = sshll.u32 %s574_s12, 7  ;;  %s378_s28 = sshll.u32 %s119_s26, 3 }
  0x18   : > { %s757_s25 = scalar_select %p661_p7, 1, 0 }
  0x19   : > { %s670_s3 = scalar_lea.hbm %s748_s1, %s404_s27  ;;  %s123_s4 = scalar_lea.vmem [#allocation6], %s378_s28 }
  0x1a   : > { %s131_s5 = sshll.u32 %s123_s4, 4  ;;  %p672_p10 = pnand %p427_p3, %p56_p5  ;;  %s132_s5 = int_to_ptr.vmem [resolvable:$true] %s131_s5 }
  0x1b   : > { %s120_s7 = scalar_lea.sflag [#allocation3], %s119_s26  ;;  %s478_s8 = scalar_lea.hbm %s670_s3, 128 }
  0x1c   : > { %p479_p2 = scmp.ne.s32.totalorder %s670_s3, %s478_s8  ;;  %p480_p11 = pneg %p672_p10 }
  0x1d   : > { %s483_s20 = scalar_lea.hbm %s748_s1, 256  ;;  %p484_p0 = scmp.lt.s32.totalorder %s670_s3, %s748_s1 }
  0x1e   : > { %p481_p12 = pnand %p480_p11, %p479_p2  ;;  %p485_p3 = scmp.lt.s32.totalorder %s483_s20, %s478_s8 }
  0x20   : > { %p482_p13 = pneg %p481_p12  ;;  %p486_p5 = por %p485_p3, %p484_p0 }
  0x22   : > { %p487_p9 = pnand %p486_p5, %p482_p13 }
  0x24   : > { %490 = shalt.err (!%p487_p9)
}
  0x25   : > { %s491_s23 = scalar_lea.vmem %s132_s5, 128  ;;  %s577_s26 = smov [#allocation6]  }
  0x26   : > { %p492_p1 = scmp.ne.s32.totalorder %s132_s5, %s491_s23  ;;  %s496_s27 = sshll.u32 %s577_s26, 4  ;;  %s497_s27 = int_to_ptr.vmem [resolvable:$false] %s496_s27 }
  0x27   : > { %s498_s28 = scalar_lea.vmem %s497_s27, 256  ;;  %p499_p2 = scmp.lt.s32.totalorder %s132_s5, %s497_s27 }
  0x28   : > { %p494_p6 = pnand %p492_p1, %p480_p11  ;;  %p500_p12 = scmp.lt.s32.totalorder %s498_s28, %s491_s23 }
  0x2a   : > { %p495_p7 = pneg %p494_p6  ;;  %p501_p4 = por %p500_p12, %p499_p2 }
  0x2c   : > { %p502_p8 = pnand %p501_p4, %p495_p7 }
  0x2e   : > { %505 = shalt.err (!%p502_p8)
}
  0x2f   : > { %421 = dma.hbm_to_vmem [thread:$0]  (!%p672_p10), %s670_s3, 128, %s132_s5, %s120_s7  }
  0x30   : > { %p759_p13 = scmp.ne.s32.totalorder %s756_s17, 0 }
  0x31   : > { %p760_p9 = scmp.eq.s32.totalorder (!%p759_p13), %s615_s13, 0 }
  0x32   : > { %140 = sbr.rel (%p759_p13) target bundleno = 143 (0x8f), region = 28 }
  0x37   : > { %549 = dma.done.wait (%p760_p9), [#allocation5], 32   ;;  %p761_p1 = pmov %p760_p9 }
  0x38   : > { %s697_s29 = sand.u32 1, %s566_s10   ;;  %p762_p4 = scmp.ne.s32.totalorder %s754_s15, 0 }
  0x39   : > { %551 = vsyncadd (%p761_p1), [#allocation5], 4294967264  ;;  %s383_s30 = sshll.u32 %s697_s29, 3  ;;  %s147_s4 = scalar_lea.sflag [#allocation3], %s697_s29 }
  0x3a   : > { %s150_s6 = scalar_lea.vmem [#allocation6], %s383_s30 }
  0x3b   : > { %553 = dma.done.wait (%p762_p4), %s147_s4, 128  }
  0x3c   : > { %555 = vsyncadd (%p762_p4), %s147_s4, 4294967168 }
  0x3d   : > { %155 = sfence }
  0x3e   : > { %s175_s17 = sld [smem:[#allocation2]]  ;;  %v174_v0 = vld [vmem:[%s150_s6] sm:$0xff]  ;;  %v241_v35 = vlaneseq  ;;  %s384_s15 = sshll.u32 %s697_s29, 2  ;;  %vm262_vm1 = vcmask 1040384  }
  0x3f   : > { %s385_s3 = sld [smem:[#allocation2 + $0x80]]  ;;  %s171_s21 = scalar_lea.vmem [#allocation7], %s384_s15 }
  0x40   : > { %s386_s5 = sld [smem:[#allocation2 + $0x1]]  ;;  %v242_v36 = vshrl.u32 %v241_v35, 7  ;;  %s292_s22 = sshll.u32 %s171_s21, 4  ;;  %s707_s22 = int_to_ptr.vmem [resolvable:$true] %s292_s22 }
  0x41   : > { %s388_s7 = sld [smem:[#allocation2 + $0x81]]  ;;  %s405_s23 = sshll.u32 %s615_s13, 6 }
  0x42   : > { %s390_s8 = sld [smem:[#allocation2 + $0x2]]  ;;  %v243_v38 = vsub.s32 0, %v242_v36  ;;  %v247_v39 = vsub.s32 4, %v242_v36  ;;  %s290_s28 = scalar_lea.hbm %s749_s2, %s405_s23 }
  0x43   : > { %s392_s14 = sld [smem:[#allocation2 + $0x82]]  ;;  %s278_s30 = scalar_lea.sflag [#allocation4], %s697_s29 }
  0x44   : > { %v176_v1 = vstv %s175_s17  ;;  %s394_s19 = sld [smem:[#allocation2 + $0x3]]  ;;  %s506_s4 = scalar_lea.vmem %s707_s22, 64 }
  0x45   : > { %v179_v2 = vstv %s385_s3  ;;  %s396_s20 = sld [smem:[#allocation2 + $0x83]]  ;;  %v177_v4 = vmul.f32 %v176_v1, %v174_v0  ;;  %p507_p6 = scmp.ne.s32.totalorder %s707_s22, %s506_s4 }
  0x46   : > { %v182_v3 = vstv %s386_s5  ;;  %v180_v7 = vmul.f32 %v179_v2, %v174_v0  ;;  %p763_p8 = scmp.ne.s32.totalorder %s757_s25, 0  ;;  %s578_s13 = smov [#allocation7]  }
  0x47   : > { %v183_v5 = vmul.f32 %v182_v3, %v174_v0  ;;  %v190_v6 = vstv %s388_s7  ;;  %s510_s6 = sshll.u32 %s578_s13, 4  ;;  %s511_s6 = int_to_ptr.vmem [resolvable:$false] %s510_s6 }
  0x48   : > { %v191_v8 = vmul.f32 %v190_v6, %v174_v0  ;;  %v198_v9 = vstv %s390_s8  ;;  %p508_p7 = pnand %p507_p6, %p763_p8  ;;  %s512_s17 = scalar_lea.vmem %s511_s6, 128 }
  0x49   : > { %v387_v10 = vrot.slane %v183_v5, 9  ;;  %v199_v11 = vmul.f32 %v198_v9, %v174_v0  ;;  %v206_v12 = vstv %s392_s14  ;;  %p513_p11 = scmp.lt.s32.totalorder %s707_s22, %s511_s6  ;;  %p514_p0 = scmp.lt.s32.totalorder %s512_s17, %s506_s4 }
  0x4a   : > { %v389_v13 = vrot.slane %v191_v8, 9  ;;  %v207_v14 = vmul.f32 %v206_v12, %v174_v0  ;;  %v214_v15 = vstv %s394_s19  ;;  %p509_p10 = pneg %p508_p7 }
  0x4b   : > { %v188_v16 = vadd.f32 %v387_v10, %v177_v4  ;;  %v391_v17 = vrot.slane %v199_v11, 10  ;;  %v215_v18 = vmul.f32 %v214_v15, %v174_v0  ;;  %v222_v19 = vstv %s396_s20  ;;  %p515_p3 = por %p514_p0, %p513_p11 }
  0x4c   : > { %v196_v20 = vadd.f32 %v389_v13, %v180_v7  ;;  %v393_v21 = vrot.slane %v207_v14, 10  ;;  %v223_v22 = vmul.f32 %v222_v19, %v174_v0 }
  0x4d   : > { %v204_v23 = vadd.f32 %v391_v17, %v188_v16  ;;  %v395_v24 = vrot.slane %v215_v18, 11  ;;  %p516_p5 = pnand %p515_p3, %p509_p10 }
  0x4e   : > { %v212_v25 = vadd.f32 %v393_v21, %v196_v20  ;;  %v397_v26 = vrot.slane %v223_v22, 11 }
  0x4f   : > { %v220_v27 = vadd.f32 %v395_v24, %v204_v23 }
  0x50   : > { %v228_v28 = vadd.f32 %v397_v26, %v212_v25 }
  0x52   : > { %v229_v29 = vsub.f32 %v228_v28, %v220_v27 }
  0x54   : > { %v230_v30 = vand.u32 2147483647, %v229_v29  ;;  %vm236_vm0 = vcmp.ge.f32.partialorder %v229_v29, 0.0 }
  0x56   : > { %v231_v31 = vsub.f32 0.0, %v230_v30 }
  0x58   : > { %v232_v32 = vmul.f32 1.442695, %v231_v31 }
  0x5a   : > { %463 = vpow2.f32 %v232_v32 }
  0x67   : > { %v464_v33 = vpop.eup %463 }
  0x68   : > { %v234_v34 = vadd.f32 1.0, %v464_v33 }
  0x6a   : > { %465 = vrcp.f32 %v234_v34 }
  0x77   : > { %v466_v37 = vpop.eup %465 }
  0x78   : > { %v237_v40 = vmul.f32 %v466_v37, %v464_v33 }
  0x7a   : > { %v238_v41 = vsel %vm236_vm0, %v466_v37, %v237_v40 }
  0x7b   : > { %v239_v42 = vsub.f32 1.0, %v238_v41  ;;  %v255_v43 = vrot.slane %v238_v41, %v243_v38  ;;  %v259_v44 = vrot.slane %v238_v41, %v247_v39 }
  0x7d   : > { %v244_v45 = vrot.slane %v239_v42, %v243_v38  ;;  %v248_v46 = vrot.slane %v239_v42, %v247_v39 }
  0x7f   : > { %v263_v47 = vsel %vm262_vm1, %v244_v45, %v255_v43  ;;  %v264_v48 = vsel %vm262_vm1, %v248_v46, %v259_v44 }
  0x80   : > { %v267_v49 = vcombine.low %v263_v47, %v264_v48 }
  0x82   : > { %398 = vst.sshfl [vmem:[%s171_s21] sm:$0x33 pattern:$0x76325410] %v267_v49 }
  0x83   : > { %519 = shalt.err (!%p516_p5)
}
  0x84   : > { %s520_s3 = scalar_lea.hbm %s290_s28, 64  ;;  %s524_s7 = scalar_lea.hbm %s749_s2, 128 }
  0x85   : > { %p521_p2 = scmp.ne.s32.totalorder %s290_s28, %s520_s3  ;;  %p525_p9 = scmp.lt.s32.totalorder %s290_s28, %s749_s2 }
  0x86   : > { %p526_p1 = scmp.lt.s32.totalorder %s524_s7, %s520_s3 }
  0x87   : > { %p522_p12 = pnand %p521_p2, %p763_p8 }
  0x88   : > { %p527_p4 = por %p526_p1, %p525_p9 }
  0x89   : > { %p523_p13 = pneg %p522_p12 }
  0x8b   : > { %p528_p6 = pnand %p527_p4, %p523_p13 }
  0x8d   : > { %531 = shalt.err (!%p528_p6)
}
  0x8e   : > { %412 = dma.vmem_to_hbm [thread:$0]  (%p763_p8), %s707_s22, 64, %s290_s28, %s278_s30  }
  0x8f PF: > { %s304_s19 = sand.u32 1, %s562_s9   ;;  %p764_p7 = scmp.ne.s32.totalorder %s755_s16, 0 }
  0x90   : > { %p765_p10 = scmp.ge.s32.totalorder %s574_s12, 2  ;;  %s305_s20 = scalar_lea.sflag [#allocation4], %s304_s19 }
  0x92   : > { %p423_p11 = pnand %p765_p10, %p764_p7 }
  0x94   : > { %p424_p0 = pneg %p423_p11 }
  0x96   : > { %557 = dma.done.wait (%p424_p0), %s305_s20, 64  }
  0x97   : > { %559 = vsyncadd (%p424_p0), %s305_s20, 4294967232  ;;  %p16_p3 = scmp.ge.s32.totalorder %s640_s18, 4   ;;  %s766_s9 = smov %s566_s10 }
  0x98   : > { %s767_s10 = smov %s570_s11  ;;  %s768_s11 = smov %s657_s24 }
  0x99   : > { %s769_s12 = smov %s640_s18  ;;  %18 = sbr.rel (!%p16_p3) target bundleno = 6 (0x6), region = 78 }
  0x9e   :  { %310 = vsyncpa [#allocation3], 1 }
  0x9f   :  { %312 = vsyncpa [#allocation3 + $0x1], 1 }
  0xa0   :  { %313 = vsyncpa [#allocation4], 1 }
  0xa1   :  { %315 = vsyncpa [#allocation4 + $0x1], 1 }
  0xa2   :  { %316 = vsyncpa [#allocation5], 1 }
  0xa3   :  { %318 = vsyncpa [#allocation5 + $0x1], 1 }

</bundles_post_ra>
